<compile_context>
chip_gen: v7x
topology: tpu7x:2x2x1
jax: 0.10.0
libtpu: 0.0.40
codegen_flags: <defaults>
</compile_context>

<pallas_src>
import functools

import jax
import jax.numpy as jnp
from jax.experimental import pallas as pl
from jax.experimental.pallas import tpu as pltpu

HIDDEN = 128    # shared / value / advantage hidden width (module defaults = [128])
OUT_PAD = 128   # lane-dense padded output width: lanes [0, A) = q, lane A = intent


def _fused_kernel(x_ref, ws_ref, bs_ref, wcat_ref, bcat_ref, whead_ref, bhead_ref,
                  out_ref, *, action_dim):
    w_dtype = ws_ref.dtype           # MXU operand dtype (f32 or bf16)
    h2 = 2 * HIDDEN

    x = x_ref[...]

    # ---- shared trunk: Linear + ReLU (f32 accumulate, f32 bias/elementwise) ----
    shared = jnp.dot(x.astype(w_dtype), ws_ref[...],
                     preferred_element_type=jnp.float32) + bs_ref[...]
    shared = jnp.maximum(shared, 0.0)

    # ---- one wide MXU pass: [value hidden | advantage hidden | folded intent] ----
    h = jnp.dot(shared.astype(w_dtype), wcat_ref[...],
                preferred_element_type=jnp.float32) + bcat_ref[...]

    va = jnp.maximum(h[:, :h2], 0.0)           # ReLU on value/adv hidden (lane-aligned)
    intent_slab = h[:, h2:h2 + OUT_PAD]        # intent logit at lane `action_dim`, rest 0

    # ---- block-diagonal fused heads: lanes [0, A) = advantage, lane A = value ----
    heads = jnp.dot(va.astype(w_dtype), whead_ref[...],
                    preferred_element_type=jnp.float32) + bhead_ref[...]

    lanes = jax.lax.broadcasted_iota(jnp.int32, heads.shape, 1)
    a_mask = lanes < action_dim
    # lane A of `heads` holds the value, lanes > A are exactly zero (zero-padded
    # whead/bhead), so sum(heads) - val == sum(advantage).
    val = jnp.sum(jnp.where(lanes == action_dim, heads, 0.0), axis=-1, keepdims=True)
    adv_mean = (jnp.sum(heads, axis=-1, keepdims=True) - val) * (1.0 / action_dim)

    # q in lanes [0, A), intent logit in lane A, zeros elsewhere — one fused store.
    out_ref[...] = jnp.where(a_mask, heads + val - adv_mean,
                             intent_slab).astype(out_ref.dtype)


def _round_up(x, m):
    return (x + m - 1) // m * m


def _choose_tb(batch, cap=1024):
    """Balanced batch tile: multiple of 8, <= cap, and >= 2 grid steps whenever
    batch > 8 (so v7x can shard the parallel batch axis over its 2 TensorCores;
    the extra grid step is negligible on single-TC v5e/v6e)."""
    if batch <= 8:
        return batch
    n_steps = max(2, pl.cdiv(batch, cap))
    return min(cap, _round_up(pl.cdiv(batch, n_steps), 8))


def fuse_params(params, action_dim, weight_dtype=jnp.float32):
    """Fold / concatenate the per-layer weights into the 3 fused matmul operands.

    weight_dtype=jnp.bfloat16 is valid on all TPU generations (bf16 MXU operands,
    f32 accumulation); it halves resident-weight DMA."""
    H = HIDDEN
    A = action_dim
    assert A + 1 <= OUT_PAD, "action_dim must fit in the padded output slab"

    # Fold intent head (no nonlinearity between wi1 and wi2; Dropout(p=0) is identity).
    wi_fold = params["wi1"] @ params["wi2"]                   # [H, 1]
    bi_fold = params["bi1"] @ params["wi2"] + params["bi2"]   # [1, 1]

    # W_cat [H, 3H]: cols [0,H) = value hidden, [H,2H) = advantage hidden,
    # col 2H+A = folded intent (lands at lane A of the third 128-lane tile).
    wcat = jnp.zeros((H, 3 * H), jnp.float32)
    wcat = wcat.at[:, :H].set(params["wv1"])
    wcat = wcat.at[:, H:2 * H].set(params["wa1"])
    wcat = wcat.at[:, 2 * H + A].set(wi_fold[:, 0])
    bcat = jnp.zeros((1, 3 * H), jnp.float32)
    bcat = bcat.at[:, :H].set(params["bv1"])
    bcat = bcat.at[:, H:2 * H].set(params["ba1"])
    bcat = bcat.at[:, 2 * H + A].set(bi_fold[:, 0])

    # Block-diagonal fused heads W_head [2H, OUT_PAD]:
    #   rows [0,H)   -> value weight into lane A
    #   rows [H,2H)  -> advantage weights into lanes [0, A)
    # Lanes > A stay exactly zero (the kernel's adv-sum trick relies on this).
    whead = jnp.zeros((2 * H, OUT_PAD), jnp.float32)
    whead = whead.at[:H, A].set(params["wv2"][:, 0])
    whead = whead.at[H:2 * H, :A].set(params["wa2"])
    bhead = jnp.zeros((1, OUT_PAD), jnp.float32)
    bhead = bhead.at[:, :A].set(params["ba2"])
    bhead = bhead.at[:, A].set(params["bv2"][0, 0])

    return dict(
        ws=params["ws"].astype(weight_dtype),
        bs=params["bs"].astype(jnp.float32),
        wcat=wcat.astype(weight_dtype),
        bcat=bcat,
        whead=whead.astype(weight_dtype),
        bhead=bhead,
    )


def dueling_dqn_intent_forward(x, fused, action_dim, *, tb=None,
                               out_dtype=jnp.float32, return_slab=False):
    """x: [batch, state_dim] (any float dtype; cast to the MXU operand dtype
    happens inside the kernel).  fused: output of fuse_params().

    Returns (q [batch, action_dim], intent_logits [batch, 1]) in `out_dtype`,
    or, if return_slab=True, the raw lane-dense [batch, 128] slab (lanes [0,A)
    = q, lane A = intent logit) so the consumer can index it inside its own jit
    without extra materializing slices."""
    B, S = x.shape

    if tb is None:
        tb = _choose_tb(B)
    elif B <= 8:
        tb = B
    else:
        tb = max(8, min(_round_up(tb, 8), _round_up(B, 8)))

    grid = (pl.cdiv(B, tb),)   # partial last block handled by Pallas (no jnp.pad)
    kernel = functools.partial(_fused_kernel, action_dim=action_dim)

    out = pl.pallas_call(
        kernel,
        out_shape=jax.ShapeDtypeStruct((B, OUT_PAD), out_dtype),
        grid=grid,
        in_specs=[
            pl.BlockSpec((tb, S), lambda i: (i, 0)),                     # x tile
            pl.BlockSpec((S, HIDDEN), lambda i: (0, 0)),                 # Ws (resident)
            pl.BlockSpec((1, HIDDEN), lambda i: (0, 0)),                 # bs
            pl.BlockSpec((HIDDEN, 3 * HIDDEN), lambda i: (0, 0)),        # W_cat
            pl.BlockSpec((1, 3 * HIDDEN), lambda i: (0, 0)),             # b_cat
            pl.BlockSpec((2 * HIDDEN, OUT_PAD), lambda i: (0, 0)),       # W_head
            pl.BlockSpec((1, OUT_PAD), lambda i: (0, 0)),                # b_head
        ],
        out_specs=pl.BlockSpec((tb, OUT_PAD), lambda i: (i, 0)),
        compiler_params=pltpu.CompilerParams(
            dimension_semantics=("parallel",),      # megacore sharding on v7x
            vmem_limit_bytes=32 * 1024 * 1024),     # covers tb=1024 on v5e too
    )(x, fused["ws"], fused["bs"], fused["wcat"], fused["bcat"],
      fused["whead"], fused["bhead"])

    if return_slab:
        return out
    q = out[:, :action_dim]
    intent_logits = out[:, action_dim:action_dim + 1]
    return q, intent_logits


# ----------------------------- test harness --------------------------------

def _init_linear(key, fan_in, fan_out):
    """torch.nn.Linear-style uniform(-1/sqrt(fan_in), 1/sqrt(fan_in)).
    Weight stored [in, out] (transposed relative to torch)."""
    kw, kb = jax.random.split(key)
    bound = 1.0 / jnp.sqrt(jnp.float32(fan_in))
    w = jax.random.uniform(kw, (fan_in, fan_out), jnp.float32, -bound, bound)
    b = jax.random.uniform(kb, (1, fan_out), jnp.float32, -bound, bound)
    return w, b


def make_params(key, state_dim, hidden=128, action_dim=16, intent_hidden=256):
    keys = jax.random.split(key, 7)
    p = {}
    p["ws"], p["bs"] = _init_linear(keys[0], state_dim, hidden)
    p["wv1"], p["bv1"] = _init_linear(keys[1], hidden, hidden)
    p["wv2"], p["bv2"] = _init_linear(keys[2], hidden, 1)
    p["wa1"], p["ba1"] = _init_linear(keys[3], hidden, hidden)
    p["wa2"], p["ba2"] = _init_linear(keys[4], hidden, action_dim)
    p["wi1"], p["bi1"] = _init_linear(keys[5], hidden, intent_hidden)
    p["wi2"], p["bi2"] = _init_linear(keys[6], intent_hidden, 1)
    return p


def _reference_forward(x, p):
    """Pure-JAX reference mirroring the PyTorch forward (dense branch)."""
    shared = jnp.maximum(x @ p["ws"] + p["bs"], 0.0)
    v = jnp.maximum(shared @ p["wv1"] + p["bv1"], 0.0)
    v = v @ p["wv2"] + p["bv2"]
    a = jnp.maximum(shared @ p["wa1"] + p["ba1"], 0.0)
    a = a @ p["wa2"] + p["ba2"]
    q = v + a - jnp.mean(a, axis=-1, keepdims=True)
    i = (shared @ p["wi1"] + p["bi1"]) @ p["wi2"] + p["bi2"]
    return q, i


if __name__ == "__main__":
    key = jax.random.PRNGKey(0)
    k_x, k_p, k_x2 = jax.random.split(key, 3)

    batch, state_dim, action_dim = 8, 64, 16
    x = jax.random.normal(k_x, (batch, state_dim), jnp.float32)
    params = make_params(k_p, state_dim=state_dim, hidden=HIDDEN,
                         action_dim=action_dim, intent_hidden=256)
    q_ref, i_ref = _reference_forward(x, params)

    # --- f32 path (reference-exact modulo fusion reassociation) ---
    fused_f32 = fuse_params(params, action_dim, weight_dtype=jnp.float32)
    q, intent = dueling_dqn_intent_forward(x, fused_f32, action_dim)
    q = jax.block_until_ready(q)
    intent = jax.block_until_ready(intent)
    assert q.shape == (batch, action_dim)
    assert intent.shape == (batch, 1)
    assert jnp.allclose(q, q_ref, atol=2e-4, rtol=2e-4)
    assert jnp.allclose(intent, i_ref, atol=2e-4, rtol=2e-4)

    # --- multi-tile grid path: batch NOT a multiple of the tile (partial last
    #     block, no padding), forced small tile ---
    x2 = jax.random.normal(k_x2, (40, state_dim), jnp.float32)
    q2, i2 = dueling_dqn_intent_forward(x2, fused_f32, action_dim, tb=16)
    q2 = jax.block_until_ready(q2)
    q2_ref, i2_ref = _reference_forward(x2, params)
    assert q2.shape == (40, action_dim) and i2.shape == (40, 1)
    assert jnp.allclose(q2, q2_ref, atol=2e-4, rtol=2e-4)
    assert jnp.allclose(i2, i2_ref, atol=2e-4, rtol=2e-4)

    # --- default (balanced, >=2-step) tile selection on the same odd batch ---
    q2b, i2b = dueling_dqn_intent_forward(x2, fused_f32, action_dim)
    q2b = jax.block_until_ready(q2b)
    assert jnp.allclose(q2b, q2_ref, atol=2e-4, rtol=2e-4)
    assert jnp.allclose(i2b, i2_ref, atol=2e-4, rtol=2e-4)

    # --- bf16 MXU-operand path (valid on v5e/v6e/v7x): f32 accumulate/elementwise,
    #     plus bf16 output slab and slab-return mode ---
    fused_bf16 = fuse_params(params, action_dim, weight_dtype=jnp.bfloat16)
    slab = dueling_dqn_intent_forward(x, fused_bf16, action_dim,
                                      out_dtype=jnp.bfloat16, return_slab=True)
    slab = jax.block_until_ready(slab)
    assert slab.shape == (batch, OUT_PAD) and slab.dtype == jnp.bfloat16
    q3 = slab[:, :action_dim].astype(jnp.float32)
    i3 = slab[:, action_dim:action_dim + 1].astype(jnp.float32)
    assert jnp.allclose(q3, q_ref, atol=2e-1, rtol=2e-1)
    assert jnp.allclose(i3, i_ref, atol=2e-1, rtol=2e-1)

    print("KERNEL_OK")
</pallas_src>

<mosaic_0001>
module attributes {stable_mosaic.version = 11 : i64} {
  func.func @_fused_kernel(%arg0: i32, %arg1: memref<8x64xf32, #tpu.memory_space<vmem>>, %arg2: memref<64x128xf32, #tpu.memory_space<vmem>>, %arg3: memref<1x128xf32, #tpu.memory_space<vmem>>, %arg4: memref<128x384xf32, #tpu.memory_space<vmem>>, %arg5: memref<1x384xf32, #tpu.memory_space<vmem>>, %arg6: memref<256x128xf32, #tpu.memory_space<vmem>>, %arg7: memref<1x128xf32, #tpu.memory_space<vmem>>, %arg8: memref<8x128xf32, #tpu.memory_space<vmem>>) attributes {dimension_semantics = [#tpu.dimension_semantics<parallel>], iteration_bounds = array<i64: 1>, scalar_prefetch = 0 : i64, scratch_operands = 0 : i64, tpu.core_type = #tpu.core_type<tc>, window_params = [{transform_indices = @transform_0, window_bounds = array<i64: 8, 64>}, {pipeline_mode = #tpu.pipeline_mode<synchronous>, transform_indices = @transform_1, window_bounds = array<i64: 64, 128>}, {pipeline_mode = #tpu.pipeline_mode<synchronous>, transform_indices = @transform_2, window_bounds = array<i64: 1, 128>}, {pipeline_mode = #tpu.pipeline_mode<synchronous>, transform_indices = @transform_3, window_bounds = array<i64: 128, 384>}, {pipeline_mode = #tpu.pipeline_mode<synchronous>, transform_indices = @transform_4, window_bounds = array<i64: 1, 384>}, {pipeline_mode = #tpu.pipeline_mode<synchronous>, transform_indices = @transform_5, window_bounds = array<i64: 256, 128>}, {pipeline_mode = #tpu.pipeline_mode<synchronous>, transform_indices = @transform_6, window_bounds = array<i64: 1, 128>}, {transform_indices = @transform_7, window_bounds = array<i64: 8, 128>}]} {
    %c0 = arith.constant 0 : index
    %c0_0 = arith.constant 0 : index
    %0 = vector.load %arg1[%c0, %c0_0] : memref<8x64xf32, #tpu.memory_space<vmem>>, vector<8x64xf32>
    %c0_1 = arith.constant 0 : index
    %c0_2 = arith.constant 0 : index
    %1 = vector.load %arg2[%c0_1, %c0_2] : memref<64x128xf32, #tpu.memory_space<vmem>>, vector<64x128xf32>
    %cst = arith.constant dense<0.000000e+00> : vector<8x128xf32>
    %2 = tpu.matmul %0, %1, %cst {dimension_numbers = #tpu.dot_dimension_numbers<[1], [0], [0], [1], [0, 0, 1, 1], [], []>} : vector<8x64xf32>, vector<64x128xf32>, vector<8x128xf32> -> vector<8x128xf32>
    %c0_3 = arith.constant 0 : index
    %c0_4 = arith.constant 0 : index
    %3 = vector.load %arg3[%c0_3, %c0_4] : memref<1x128xf32, #tpu.memory_space<vmem>>, vector<1x128xf32>
    %4 = vector.broadcast %3 : vector<1x128xf32> to vector<8x128xf32>
    %5 = arith.addf %2, %4 : vector<8x128xf32>
    %cst_5 = arith.constant 0.000000e+00 : f32
    %6 = vector.broadcast %cst_5 : f32 to vector<8x128xf32>
    %7 = arith.maximumf %5, %6 : vector<8x128xf32>
    %c0_6 = arith.constant 0 : index
    %c0_7 = arith.constant 0 : index
    %8 = vector.load %arg4[%c0_6, %c0_7] : memref<128x384xf32, #tpu.memory_space<vmem>>, vector<128x384xf32>
    %cst_8 = arith.constant dense<0.000000e+00> : vector<8x384xf32>
    %9 = tpu.matmul %7, %8, %cst_8 {dimension_numbers = #tpu.dot_dimension_numbers<[1], [0], [0], [1], [0, 0, 1, 1], [], []>} : vector<8x128xf32>, vector<128x384xf32>, vector<8x384xf32> -> vector<8x384xf32>
    %c0_9 = arith.constant 0 : index
    %c0_10 = arith.constant 0 : index
    %10 = vector.load %arg5[%c0_9, %c0_10] : memref<1x384xf32, #tpu.memory_space<vmem>>, vector<1x384xf32>
    %11 = vector.broadcast %10 : vector<1x384xf32> to vector<8x384xf32>
    %12 = arith.addf %9, %11 : vector<8x384xf32>
    %13 = vector.extract_strided_slice %12 {offsets = [0, 0], sizes = [8, 256], strides = [1, 1]} : vector<8x384xf32> to vector<8x256xf32>
    %cst_11 = arith.constant 0.000000e+00 : f32
    %14 = vector.broadcast %cst_11 : f32 to vector<8x256xf32>
    %15 = arith.maximumf %13, %14 : vector<8x256xf32>
    %16 = vector.extract_strided_slice %12 {offsets = [0, 256], sizes = [8, 128], strides = [1, 1]} : vector<8x384xf32> to vector<8x128xf32>
    %c0_12 = arith.constant 0 : index
    %c0_13 = arith.constant 0 : index
    %17 = vector.load %arg6[%c0_12, %c0_13] : memref<256x128xf32, #tpu.memory_space<vmem>>, vector<256x128xf32>
    %cst_14 = arith.constant dense<0.000000e+00> : vector<8x128xf32>
    %18 = tpu.matmul %15, %17, %cst_14 {dimension_numbers = #tpu.dot_dimension_numbers<[1], [0], [0], [1], [0, 0, 1, 1], [], []>} : vector<8x256xf32>, vector<256x128xf32>, vector<8x128xf32> -> vector<8x128xf32>
    %c0_15 = arith.constant 0 : index
    %c0_16 = arith.constant 0 : index
    %19 = vector.load %arg7[%c0_15, %c0_16] : memref<1x128xf32, #tpu.memory_space<vmem>>, vector<1x128xf32>
    %20 = vector.broadcast %19 : vector<1x128xf32> to vector<8x128xf32>
    %21 = arith.addf %18, %20 : vector<8x128xf32>
    %22 = tpu.iota {dimensions = array<i32: 1>} : vector<8x128xi32>
    %c16_i32 = arith.constant 16 : i32
    %23 = vector.broadcast %c16_i32 : i32 to vector<8x128xi32>
    %24 = arith.cmpi slt, %22, %23 : vector<8x128xi32>
    %c16_i32_17 = arith.constant 16 : i32
    %25 = vector.broadcast %c16_i32_17 : i32 to vector<8x128xi32>
    %26 = arith.cmpi eq, %22, %25 : vector<8x128xi32>
    %cst_18 = arith.constant 0.000000e+00 : f32
    %27 = vector.broadcast %cst_18 : f32 to vector<8x128xf32>
    %28 = arith.select %26, %21, %27 : vector<8x128xi1>, vector<8x128xf32>
    %cst_19 = arith.constant dense<0.000000e+00> : vector<8xf32>
    %29 = vector.multi_reduction <add>, %28, %cst_19 [1] : vector<8x128xf32> to vector<8xf32>
    %30 = vector.shape_cast %29 : vector<8xf32> to vector<8x1xf32>
    %cst_20 = arith.constant dense<0.000000e+00> : vector<8xf32>
    %31 = vector.multi_reduction <add>, %21, %cst_20 [1] : vector<8x128xf32> to vector<8xf32>
    %32 = vector.shape_cast %31 : vector<8xf32> to vector<8x1xf32>
    %33 = arith.subf %32, %30 : vector<8x1xf32>
    %cst_21 = arith.constant 6.250000e-02 : f32
    %34 = vector.broadcast %cst_21 : f32 to vector<8x1xf32>
    %35 = arith.mulf %33, %34 : vector<8x1xf32>
    %36 = vector.broadcast %30 : vector<8x1xf32> to vector<8x128xf32>
    %37 = arith.addf %21, %36 : vector<8x128xf32>
    %38 = vector.broadcast %35 : vector<8x1xf32> to vector<8x128xf32>
    %39 = arith.subf %37, %38 : vector<8x128xf32>
    %40 = arith.select %24, %39, %16 : vector<8x128xi1>, vector<8x128xf32>
    %c0_22 = arith.constant 0 : index
    %c0_23 = arith.constant 0 : index
    %41 = vector.load %arg8[%c0_22, %c0_23] : memref<8x128xf32, #tpu.memory_space<vmem>>, vector<8x128xf32>
    tpu.vector_store %arg8[%c0_22, %c0_23], %40 {strides = array<i32>} : memref<8x128xf32, #tpu.memory_space<vmem>>, vector<8x128xf32>,
    return
  }
  func.func @transform_0(%arg0: i32) -> (i32, i32) {
    %c0_i32 = arith.constant 0 : i32
    %c0_i32_0 = arith.constant 0 : i32
    return %arg0, %c0_i32 : i32, i32
  }
  func.func @transform_1(%arg0: i32) -> (i32, i32) {
    %c0_i32 = arith.constant 0 : i32
    %c0_i32_0 = arith.constant 0 : i32
    %c0_i32_1 = arith.constant 0 : i32
    return %c0_i32, %c0_i32_0 : i32, i32
  }
  func.func @transform_2(%arg0: i32) -> (i32, i32) {
    %c0_i32 = arith.constant 0 : i32
    %c0_i32_0 = arith.constant 0 : i32
    %c0_i32_1 = arith.constant 0 : i32
    return %c0_i32, %c0_i32_0 : i32, i32
  }
  func.func @transform_3(%arg0: i32) -> (i32, i32) {
    %c0_i32 = arith.constant 0 : i32
    %c0_i32_0 = arith.constant 0 : i32
    %c0_i32_1 = arith.constant 0 : i32
    return %c0_i32, %c0_i32_0 : i32, i32
  }
  func.func @transform_4(%arg0: i32) -> (i32, i32) {
    %c0_i32 = arith.constant 0 : i32
    %c0_i32_0 = arith.constant 0 : i32
    %c0_i32_1 = arith.constant 0 : i32
    return %c0_i32, %c0_i32_0 : i32, i32
  }
  func.func @transform_5(%arg0: i32) -> (i32, i32) {
    %c0_i32 = arith.constant 0 : i32
    %c0_i32_0 = arith.constant 0 : i32
    %c0_i32_1 = arith.constant 0 : i32
    return %c0_i32, %c0_i32_0 : i32, i32
  }
  func.func @transform_6(%arg0: i32) -> (i32, i32) {
    %c0_i32 = arith.constant 0 : i32
    %c0_i32_0 = arith.constant 0 : i32
    %c0_i32_1 = arith.constant 0 : i32
    return %c0_i32, %c0_i32_0 : i32, i32
  }
  func.func @transform_7(%arg0: i32) -> (i32, i32) {
    %c0_i32 = arith.constant 0 : i32
    %c0_i32_0 = arith.constant 0 : i32
    return %arg0, %c0_i32 : i32, i32
  }
}

</mosaic_0001>

<bundles_post_ra>
// kernel: tpu_custom_call.1
= control target key start
LH: loop header
LB: loop body
LE: loop exit
PB: predicated region body
PF: predicated region fallthrough
CT: control target
= control target key end

     0   :  { %12 = vsyncpa [#allocation3], 0  ;;  %s1012_s0 = inlined_call_operand.hbm [shape: f32[8,64], index: 0, kind: input, shape index: {}]   ;;  %s1013_s1 = inlined_call_operand.hbm [shape: f32[64,128], index: 1, kind: input, shape index: {}]   ;;  %s1014_s2 = inlined_call_operand.vmem [shape: f32[1,128], index: 2, kind: input, shape index: {}]   ;;  %s1015_s3 = inlined_call_operand.hbm [shape: f32[128,384], index: 3, kind: input, shape index: {}]   ;;  %s1016_s4 = inlined_call_operand.vmem [shape: f32[1,384], index: 4, kind: input, shape index: {}]   ;;  %s1017_s5 = inlined_call_operand.hbm [shape: f32[256,128], index: 5, kind: input, shape index: {}]   ;;  %s1018_s6 = inlined_call_operand.vmem [shape: f32[1,128], index: 6, kind: input, shape index: {}]   ;;  %s1019_s7 = inlined_call_operand.hbm [shape: f32[8,128], index: 7, kind: output, shape index: {}]  }
   0x1   :  { %13 = vsyncpa [#allocation6], 0 }
   0x2   :  { %14 = vsyncpa [#allocation9], 0 }
   0x3   :  { %15 = vsyncpa [#allocation4], 0  ;;  %s868_s24 = smov [#allocation5]   ;;  %s750_s28 = scalar_lea.hbm %s1013_s1, 1024 }
   0x4   :  { %s31_s25 = sshll.u32 %s868_s24, 4  ;;  %p751_p0 = scmp.ne.s32.totalorder %s1013_s1, %s750_s28  ;;  %s32_s25 = int_to_ptr.vmem [resolvable:$true] %s31_s25 }
   0x5   :  { %p754_p1 = scmp.lt.u32.totalorder %s750_s28, %s1013_s1 }
   0x7   :  { %p756_p2 = pnand %p754_p1, %p751_p0 }
   0x9   :  { %759 = shalt.err (!%p756_p2)
}
   0xa   :  { %s760_s10 = scalar_lea.vmem %s32_s25, 1024  ;;  %p765_p4 = scmp.lt.s32.totalorder %s32_s25, %s32_s25 }
   0xb   :  { %p761_p3 = scmp.ne.s32.totalorder %s32_s25, %s760_s10  ;;  %p766_p5 = scmp.lt.s32.totalorder %s760_s10, %s760_s10 }
   0xd   :  { %p767_p6 = por %p766_p5, %p765_p4 }
   0xf   :  { %p768_p7 = pnand %p767_p6, %p761_p3 }
  0x11   :  { %771 = shalt.err (!%p768_p7)
}
  0x12   :  { %s869_s11 = smov 128   ;;  %s870_s12 = smov 8  }
  0x13   :  { %37 = dma.hbm_to_vmem [thread:$0]  %s1013_s1, 1024, %s32_s25, [#allocation6], %s869_s11, %s869_s11, %s870_s12  }
  0x14   :  { %s871_s15 = smov [#allocation2]   ;;  %s872_s17 = smov [#allocation7]  }
  0x15   :  { %s22_s16 = sshll.u32 %s871_s15, 4  ;;  %s45_s18 = sshll.u32 %s872_s17, 4  ;;  %s23_s16 = int_to_ptr.vmem [resolvable:$true] %s22_s16  ;;  %s46_s18 = int_to_ptr.vmem [resolvable:$true] %s45_s18 }
  0x16   :  { %s772_s21 = scalar_lea.hbm %s1012_s0, 128 }
  0x17   :  { %p773_p8 = scmp.ne.s32.totalorder %s1012_s0, %s772_s21  ;;  %p776_p9 = scmp.lt.u32.totalorder %s772_s21, %s1012_s0 }
  0x19   :  { %p778_p10 = pnand %p776_p9, %p773_p8 }
  0x1b   :  { %781 = shalt.err (!%p778_p10)
}
  0x1c   :  { %s782_s1 = scalar_lea.vmem %s23_s16, 128  ;;  %p787_p12 = scmp.lt.s32.totalorder %s23_s16, %s23_s16 }
  0x1d   :  { %p783_p11 = scmp.ne.s32.totalorder %s23_s16, %s782_s1  ;;  %p788_p13 = scmp.lt.s32.totalorder %s782_s1, %s782_s1 }
  0x1f   :  { %p789_p0 = por %p788_p13, %p787_p12 }
  0x21   :  { %p790_p1 = pnand %p789_p0, %p783_p11 }
  0x23   :  { %793 = shalt.err (!%p790_p1)
}
  0x24   :  { %25 = dma.hbm_to_vmem [thread:$0]  %s1012_s0, 128, %s23_s16, [#allocation3]  }
  0x25   :  { %s794_s30 = scalar_lea.hbm %s1015_s3, 6144 }
  0x26   :  { %p795_p2 = scmp.ne.s32.totalorder %s1015_s3, %s794_s30  ;;  %p798_p3 = scmp.lt.u32.totalorder %s794_s30, %s1015_s3 }
  0x28   :  { %p800_p4 = pnand %p798_p3, %p795_p2 }
  0x2a   :  { %803 = shalt.err (!%p800_p4)
}
  0x2b   :  { %s804_s14 = scalar_lea.vmem %s46_s18, 6144  ;;  %p809_p6 = scmp.lt.s32.totalorder %s46_s18, %s46_s18 }
  0x2c   :  { %p805_p5 = scmp.ne.s32.totalorder %s46_s18, %s804_s14  ;;  %p810_p7 = scmp.lt.s32.totalorder %s804_s14, %s804_s14 }
  0x2e   :  { %p811_p8 = por %p810_p7, %p809_p6 }
  0x30   :  { %p812_p9 = pnand %p811_p8, %p805_p5 }
  0x32   :  { %815 = shalt.err (!%p812_p9)
}
  0x33   :  { %s873_s0 = smov 384   ;;  %s874_s15 = smov 24  }
  0x34   :  { %51 = dma.hbm_to_vmem [thread:$0]  %s1015_s3, 6144, %s46_s18, [#allocation6], %s873_s0, %s873_s0, %s874_s15  }
  0x35   :  { %s875_s19 = smov [#allocation8]   ;;  %s816_s23 = scalar_lea.hbm %s1017_s5, 4096 }
  0x36   :  { %s59_s20 = sshll.u32 %s875_s19, 4  ;;  %p817_p10 = scmp.ne.s32.totalorder %s1017_s5, %s816_s23  ;;  %s60_s20 = int_to_ptr.vmem [resolvable:$true] %s59_s20 }
  0x37   :  { %p820_p11 = scmp.lt.u32.totalorder %s816_s23, %s1017_s5 }
  0x39   :  { %p822_p12 = pnand %p820_p11, %p817_p10 }
  0x3b   :  { %825 = shalt.err (!%p822_p12)
}
  0x3c   :  { %s826_s27 = scalar_lea.vmem %s60_s20, 4096  ;;  %p831_p0 = scmp.lt.s32.totalorder %s60_s20, %s60_s20 }
  0x3d   :  { %p827_p13 = scmp.ne.s32.totalorder %s60_s20, %s826_s27  ;;  %p832_p1 = scmp.lt.s32.totalorder %s826_s27, %s826_s27 }
  0x3f   :  { %p833_p2 = por %p832_p1, %p831_p0 }
  0x41   :  { %p834_p3 = pnand %p833_p2, %p827_p13 }
  0x43   :  { %837 = shalt.err (!%p834_p3)
}
  0x44   :  { %65 = dma.hbm_to_vmem [thread:$0]  %s1017_s5, 4096, %s60_s20, [#allocation9], %s869_s11, %s869_s11, %s870_s12  }
  0x45   :  { %860 = dma.done.wait [#allocation3], 128  }
  0x46   :  { %861 = vsyncadd [#allocation3], 4294967168 }
  0x47   :  { %862 = dma.done.wait [#allocation6], 7168  }
  0x48   :  { %863 = vsyncadd [#allocation6], 4294960128 }
  0x49   :  { %864 = dma.done.wait [#allocation9], 4096  }
  0x4a   :  { %865 = vsyncadd [#allocation9], 4294963200  ;;  %v876_v0 = vmov 0.0|0.0   ;;  %vm877_vm0 = vmmov 0   ;;  %v878_v1 = vmov 0.0   ;;  %v81_v2 = vld [vmem:[#allocation5] sm:$0xff] }
  0x4b   :  { %638 = vmatprep.subr.bf16.mxu0 %v876_v0  ;;  %600 = vmatprep.mubr.msk.f32.mxu0 %vm877_vm0, %v878_v1  ;;  %v82_v3 = vld [vmem:[#allocation5 + $0x8] sm:$0xff]  ;;  %v83_v4 = vld [vmem:[#allocation5 + $0x10] sm:$0xff]  ;;  %v84_v6 = vld [vmem:[#allocation5 + $0x18] sm:$0xff]  ;;  %vm96_vm1 = vcmask 523264  }
  0x4c   :  { %300 = vmatprep.mubr.f32.mxu1 %v878_v1  ;;  %v639_v5 = vpack.c.bf16 %v82_v3, %v81_v2  ;;  %v642_v7 = vpack.c.bf16 %v84_v6, %v83_v4  ;;  %v172_v8 = vld [vmem:[#allocation7 + $0x8] sm:$0xff]  ;;  %v175_v9 = vld [vmem:[#allocation7 + $0x20] sm:$0xff]  ;;  %v174_v14 = vld [vmem:[#allocation7 + $0x18] sm:$0xff] }
  0x4d   :  { %v171_v10 = vld [vmem:[#allocation7] sm:$0xff]  ;;  %v86_v12 = vld [vmem:[#allocation5 + $0x28] sm:$0xff]  ;;  %v650_v13 = vpack.c.bf16 %v175_v9, %v172_v8  ;;  %v178_v16 = vld [vmem:[#allocation7 + $0x38] sm:$0xff] }
  0x4e   :  { %640 = vmatpush3.bf16.msra.mxu0 %v639_v5  ;;  %v85_v11 = vld [vmem:[#allocation5 + $0x20] sm:$0xff]  ;;  %v652_v15 = vpack.c.bf16 %v174_v14, %v171_v10  ;;  %v181_v17 = vld [vmem:[#allocation7 + $0x50] sm:$0xff]  ;;  %v180_v20 = vld [vmem:[#allocation7 + $0x48] sm:$0xff] }
  0x4f   :  { %641 = vmatprep.subr.bf16.mxu0 %v876_v0  ;;  %v177_v18 = vld [vmem:[#allocation7 + $0x30] sm:$0xff]  ;;  %651 = vmatprep.subr.bf16.mxu1 %v650_v13  ;;  %v654_v19 = vpack.c.bf16 %v181_v17, %v178_v16  ;;  %v645_v21 = vpack.c.bf16 %v86_v12, %v85_v11  ;;  %v184_v24 = vld [vmem:[#allocation7 + $0x68] sm:$0xff]  ;;  %v187_v25 = vld [vmem:[#allocation7 + $0x80] sm:$0xff] }
  0x50   :  { %v87_v22 = vld [vmem:[#allocation5 + $0x30] sm:$0xff]  ;;  %653 = vmatpush1.bf16.msra.mxu1 %v652_v15  ;;  %v656_v23 = vpack.c.bf16 %v180_v20, %v177_v18  ;;  %v88_v26 = vld [vmem:[#allocation5 + $0x38] sm:$0xff]  ;;  %v658_v27 = vpack.c.bf16 %v187_v25, %v184_v24  ;;  %v183_v28 = vld [vmem:[#allocation7 + $0x60] sm:$0xff] }
  0x51   :  { %655 = vmatprep.subr.bf16.mxu1 %v654_v19  ;;  %v186_v29 = vld [vmem:[#allocation7 + $0x78] sm:$0xff]  ;;  %v193_v31 = vld [vmem:[#allocation7 + $0xb0] sm:$0xff]  ;;  %v648_v32 = vpack.c.bf16 %v88_v26, %v87_v22  ;;  %v176_v35 = vld [vmem:[#allocation7 + $0x28] sm:$0xff] }
  0x52   :  { %643 = vmatpush3.bf16.msra.mxu0 %v642_v7  ;;  %v190_v30 = vld [vmem:[#allocation7 + $0x98] sm:$0xff]  ;;  %v173_v33 = vld [vmem:[#allocation7 + $0x10] sm:$0xff]  ;;  %v660_v34 = vpack.c.bf16 %v186_v29, %v183_v28  ;;  %v192_v38 = vld [vmem:[#allocation7 + $0xa8] sm:$0xff] }
  0x53   :  { %644 = vmatprep.subr.bf16.mxu0 %v876_v0  ;;  %v662_v36 = vpack.c.bf16 %v193_v31, %v190_v30  ;;  %v189_v37 = vld [vmem:[#allocation7 + $0x90] sm:$0xff]  ;;  %v196_v39 = vld [vmem:[#allocation7 + $0xc8] sm:$0xff]  ;;  %v199_v40 = vld [vmem:[#allocation7 + $0xe0] sm:$0xff]  ;;  %v683_v42 = vpack.c.bf16 %v176_v35, %v173_v33 }
  0x54   :  { %657 = vmatpush1.bf16.msra.mxu1 %v656_v23  ;;  %v80_v41 = vld [vmem:[#allocation2] sm:$0xff]  ;;  %v179_v43 = vld [vmem:[#allocation7 + $0x40] sm:$0xff]  ;;  %v664_v44 = vpack.c.bf16 %v192_v38, %v189_v37  ;;  %v666_v46 = vpack.c.bf16 %v199_v40, %v196_v39  ;;  %v205_v50 = vld [vmem:[#allocation7 + $0x110] sm:$0xff] }
  0x55   :  { %659 = vmatprep.subr.bf16.mxu1 %v658_v27  ;;  %v182_v45 = vld [vmem:[#allocation7 + $0x58] sm:$0xff]  ;;  %v195_v47 = vld [vmem:[#allocation7 + $0xc0] sm:$0xff]  ;;  %v185_v52 = vld [vmem:[#allocation7 + $0x70] sm:$0xff] }
  0x56   :  { %646 = vmatpush3.bf16.msra.mxu0 %v645_v21  ;;  %v198_v48 = vld [vmem:[#allocation7 + $0xd8] sm:$0xff]  ;;  %v686_v51 = vpack.c.bf16 %v182_v45, %v179_v43  ;;  %v188_v54 = vld [vmem:[#allocation7 + $0x88] sm:$0xff]  ;;  %v201_v56 = vld [vmem:[#allocation7 + $0xf0] sm:$0xff] }
  0x57   :  { %647 = vmatprep.subr.bf16.mxu0 %v876_v0  ;;  %v202_v49 = vld [vmem:[#allocation7 + $0xf8] sm:$0xff]  ;;  %v668_v53 = vpack.c.bf16 %v198_v48, %v195_v47  ;;  %v204_v57 = vld [vmem:[#allocation7 + $0x108] sm:$0xff]  ;;  %v211_v59 = vld [vmem:[#allocation7 + $0x140] sm:$0xff]  ;;  %v689_v60 = vpack.c.bf16 %v188_v54, %v185_v52 }
  0x58   :  { %661 = vmatpush1.bf16.msra.mxu1 %v660_v34  ;;  %v670_v55 = vpack.c.bf16 %v205_v50, %v202_v49  ;;  %v208_v58 = vld [vmem:[#allocation7 + $0x128] sm:$0xff]  ;;  %v191_v61 = vld [vmem:[#allocation7 + $0xa0] sm:$0xff]  ;;  %v672_v62 = vpack.c.bf16 %v204_v57, %v201_v56  ;;  %v194_v63 = vld [vmem:[#allocation7 + $0xb8] sm:$0xff] }
  0x59   :  { %663 = vmatprep.subr.bf16.mxu1 %v662_v36  ;;  %v674_v2 = vpack.c.bf16 %v211_v59, %v208_v58  ;;  %v207_v3 = vld [vmem:[#allocation7 + $0x120] sm:$0xff]  ;;  %v210_v4 = vld [vmem:[#allocation7 + $0x138] sm:$0xff]  ;;  %v692_v5 = vpack.c.bf16 %v194_v63, %v191_v61  ;;  %v197_v7 = vld [vmem:[#allocation7 + $0xd0] sm:$0xff] }
  0x5a   :  { %649 = vmatpush3.bf16.msra.mxu0 %v648_v32  ;;  %v676_v6 = vpack.c.bf16 %v210_v4, %v207_v3  ;;  %v203_v9 = vld [vmem:[#allocation7 + $0x100] sm:$0xff]  ;;  %v206_v10 = vld [vmem:[#allocation7 + $0x118] sm:$0xff]  ;;  %v209_v12 = vld [vmem:[#allocation7 + $0x130] sm:$0xff] }
  0x5b   :  { %682 = vmatprep.subr.bf16.mxu0 %v876_v0  ;;  %v698_v11 = vpack.c.bf16 %v206_v10, %v203_v9  ;;  %v212_v13 = vld [vmem:[#allocation7 + $0x148] sm:$0xff]  ;;  %v214_v15 = vld [vmem:[#allocation7 + $0x158] sm:$0xff]  ;;  %v217_v16 = vld [vmem:[#allocation7 + $0x170] sm:$0xff] }
  0x5c   :  { %665 = vmatpush1.bf16.msra.mxu1 %v664_v44  ;;  %v701_v14 = vpack.c.bf16 %v212_v13, %v209_v12  ;;  %v678_v17 = vpack.c.bf16 %v217_v16, %v214_v15  ;;  %v213_v18 = vld [vmem:[#allocation7 + $0x150] sm:$0xff]  ;;  %v216_v19 = vld [vmem:[#allocation7 + $0x168] sm:$0xff]  ;;  %v215_v20 = vld [vmem:[#allocation7 + $0x160] sm:$0xff]  ;;  %v221_v13 = vlaneseq }
  0x5d   :  { %601 = vmatmul.mubr.msk.f32.vlgmr.msra.gmra.mrb[0].mxu0 %vm96_vm1, %v80_v41  ;;  %667 = vmatprep.subr.bf16.mxu1 %v666_v46  ;;  %v680_v21 = vpack.c.bf16 %v216_v19, %v213_v18  ;;  %v218_v22 = vld [vmem:[#allocation7 + $0x178] sm:$0xff]  ;;  %v395_v24 = vld [vmem:[#allocation8 + $0x80] sm:$0xff]  ;;  %v396_v25 = vld [vmem:[#allocation8 + $0x88] sm:$0xff] }
  0x5e   :  { %684 = vmatpush3.bf16.msra.mxu0 %v683_v42  ;;  %635 = vmatprep.mubr.msk.f32.mxu0 %vm877_vm0, %v878_v1  ;;  %v200_v1 = vld [vmem:[#allocation7 + $0xe8] sm:$0xff]  ;;  %v704_v23 = vpack.c.bf16 %v218_v22, %v215_v20  ;;  %v706_v26 = vpack.c.bf16 %v396_v25, %v395_v24  ;;  %v379_v27 = vld [vmem:[#allocation8] sm:$0xff]  ;;  %v397_v30 = vld [vmem:[#allocation8 + $0x90] sm:$0xff] }
  0x5f   :  { %685 = vmatprep.subr.bf16.mxu0 %v876_v0  ;;  %v695_v8 = vpack.c.bf16 %v200_v1, %v197_v7  ;;  %v380_v28 = vld [vmem:[#allocation8 + $0x8] sm:$0xff]  ;;  %v398_v31 = vld [vmem:[#allocation8 + $0x98] sm:$0xff]  ;;  %v381_v37 = vld [vmem:[#allocation8 + $0x10] sm:$0xff] }
  0x60   :  { %669 = vmatpush1.bf16.msra.mxu1 %v668_v53  ;;  %v708_v34 = vpack.c.bf16 %v380_v28, %v379_v27  ;;  %v710_v36 = vpack.c.bf16 %v398_v31, %v397_v30  ;;  %v382_v38 = vld [vmem:[#allocation8 + $0x18] sm:$0xff]  ;;  %v399_v39 = vld [vmem:[#allocation8 + $0xa0] sm:$0xff]  ;;  %v400_v40 = vld [vmem:[#allocation8 + $0xa8] sm:$0xff]  ;;  %v489_v27 = vand.u32 127, %v221_v13 }
  0x61   :  { %671 = vmatprep.subr.bf16.mxu1 %v670_v55  ;;  %v712_v41 = vpack.c.bf16 %v382_v38, %v381_v37  ;;  %v714_v42 = vpack.c.bf16 %v400_v40, %v399_v39  ;;  %v383_v43 = vld [vmem:[#allocation8 + $0x20] sm:$0xff]  ;;  %v384_v44 = vld [vmem:[#allocation8 + $0x28] sm:$0xff]  ;;  %v401_v45 = vld [vmem:[#allocation8 + $0xb0] sm:$0xff] }
  0x62   :  { %687 = vmatpush3.bf16.msra.mxu0 %v686_v51  ;;  %v402_v46 = vld [vmem:[#allocation8 + $0xb8] sm:$0xff]  ;;  %v716_v47 = vpack.c.bf16 %v384_v44, %v383_v43  ;;  %v385_v49 = vld [vmem:[#allocation8 + $0x30] sm:$0xff]  ;;  %v403_v51 = vld [vmem:[#allocation8 + $0xc0] sm:$0xff]  ;;  %vm491_vm2 = vcmp.eq.s32.totalorder %v489_v27, 16  ;;  %vm490_vm3 = vcmp.lt.s32.totalorder %v489_v27, 16 }
  0x63   :  { %688 = vmatprep.subr.bf16.mxu0 %v876_v0  ;;  %v718_v48 = vpack.c.bf16 %v402_v46, %v401_v45  ;;  %v386_v50 = vld [vmem:[#allocation8 + $0x38] sm:$0xff]  ;;  %v404_v52 = vld [vmem:[#allocation8 + $0xc8] sm:$0xff]  ;;  %v387_v55 = vld [vmem:[#allocation8 + $0x40] sm:$0xff] }
  0x64   :  { %673 = vmatpush1.bf16.msra.mxu1 %v672_v62  ;;  %v720_v53 = vpack.c.bf16 %v386_v50, %v385_v49  ;;  %v722_v54 = vpack.c.bf16 %v404_v52, %v403_v51  ;;  %v388_v56 = vld [vmem:[#allocation8 + $0x48] sm:$0xff]  ;;  %v405_v57 = vld [vmem:[#allocation8 + $0xd0] sm:$0xff]  ;;  %v406_v58 = vld [vmem:[#allocation8 + $0xd8] sm:$0xff] }
  0x65   :  { %675 = vmatprep.subr.bf16.mxu1 %v674_v2  ;;  %v724_v59 = vpack.c.bf16 %v388_v56, %v387_v55  ;;  %v389_v61 = vld [vmem:[#allocation8 + $0x50] sm:$0xff]  ;;  %v390_v62 = vld [vmem:[#allocation8 + $0x58] sm:$0xff]  ;;  %v407_v63 = vld [vmem:[#allocation8 + $0xe0] sm:$0xff] }
  0x66   :  { %690 = vmatpush3.bf16.msra.mxu0 %v689_v60  ;;  %v726_v60 = vpack.c.bf16 %v406_v58, %v405_v57  ;;  %v408_v2 = vld [vmem:[#allocation8 + $0xe8] sm:$0xff]  ;;  %v728_v3 = vpack.c.bf16 %v390_v62, %v389_v61  ;;  %v409_v1 = vld [vmem:[#allocation8 + $0xf0] sm:$0xff]  ;;  %v219_v16 = vld [vmem:[%s1016_s4] sm:$0x7]  ;;  %s879_s4 = smov [#allocation10]  }
  0x67   :  { %691 = vmatprep.subr.bf16.mxu0 %v876_v0  ;;  %v730_v4 = vpack.c.bf16 %v408_v2, %v407_v63  ;;  %v393_v10 = vld [vmem:[#allocation8 + $0x70] sm:$0xff]  ;;  %s509_s30 = sshll.u32 %s879_s4, 4  ;;  %s510_s30 = int_to_ptr.vmem [resolvable:$true] %s509_s30 }
  0x68   :  { %677 = vmatpush1.bf16.msra.mxu1 %v676_v6  ;;  %v392_v6 = vld [vmem:[#allocation8 + $0x68] sm:$0xff]  ;;  %p843_p5 = scmp.lt.s32.totalorder %s510_s30, %s510_s30 }
  0x69   :  { %679 = vmatprep.subr.bf16.mxu1 %v678_v17 }
  0x6a   :  { %693 = vmatpush3.bf16.msra.mxu0 %v692_v5  ;;  %v391_v5 = vld [vmem:[#allocation8 + $0x60] sm:$0xff] }
  0x6b   :  { %694 = vmatprep.subr.bf16.mxu0 %v876_v0  ;;  %v732_v7 = vpack.c.bf16 %v392_v6, %v391_v5 }
  0x6c   :  { %681 = vmatpush1.bf16.msra.mxu1 %v680_v21 }
  0x6d   :  { %707 = vmatprep.subr.bf16.mxu1 %v706_v26 }
  0x6e   :  { %696 = vmatpush3.bf16.msra.mxu0 %v695_v8  ;;  %v410_v8 = vld [vmem:[#allocation8 + $0xf8] sm:$0xff] }
  0x6f   :  { %697 = vmatprep.subr.bf16.mxu0 %v876_v0  ;;  %v734_v9 = vpack.c.bf16 %v410_v8, %v409_v1 }
  0x72   :  { %699 = vmatpush3.bf16.msra.mxu0 %v698_v11  ;;  %v394_v11 = vld [vmem:[#allocation8 + $0x78] sm:$0xff] }
  0x73   :  { %700 = vmatprep.subr.bf16.mxu0 %v876_v0  ;;  %v736_v12 = vpack.c.bf16 %v394_v11, %v393_v10 }
  0x76   :  { %702 = vmatpush3.bf16.msra.mxu0 %v701_v14  ;;  %v222_v14 = vshrl.u32 %v221_v13, 7 }
  0x77   :  { %703 = vmatprep.subr.bf16.mxu0 %v876_v0  ;;  %v520_v0 = vld [vmem:[%s1014_s2] ss:$0 sm:$0xff] }
  0x78   :  { %v223_v15 = vsub.s32 0, %v222_v14  ;;  %v227_v17 = vsub.s32 1, %v222_v14 }
  0x7a   :  { %705 = vmatpush3.bf16.msra.mxu0 %v704_v23  ;;  %v224_v18 = vrot.slane %v219_v16, %v223_v15  ;;  %v228_v19 = vrot.slane %v219_v16, %v227_v17 }
 0x130   :  { %v166_v29 = vpop.f32.mrb[0].mxu0 }
 0x131   :  { %v167_v32 = vadd.f32 %v520_v0, %v166_v29  ;;  %v602_v33 = vpop.f32.mrb[1].mxu0  ;;  %v522_v29 = vld [vmem:[%s1018_s6] ss:$0 sm:$0xff]  ;;  %s838_s6 = scalar_lea.vmem %s510_s30, 128 }
 0x132   :  { %p839_p4 = scmp.ne.s32.totalorder %s510_s30, %s838_s6  ;;  %p844_p6 = scmp.lt.s32.totalorder %s838_s6, %s838_s6 }
 0x133   :  { %v170_v35 = vmax.f32 %v167_v32, 0.0 }
 0x134   :  { %p845_p7 = por %p844_p6, %p843_p5 }
 0x135   :  { %301 = vmatmul.mubr.f32.vlgmr.msra.gmra.mrb[0].mxu1 %v170_v35  ;;  %636 = vmatmul.mubr.f32.vlgmr.msra.gmra.mrb[2].mxu0 %v170_v35  ;;  %v231_v35 = vsub.s32 2, %v222_v14 }
 0x136   :  { %709 = vmatpush3.bf16.msra.mxu1 %v708_v34  ;;  %p846_p8 = pnand %p845_p7, %p839_p4 }
 0x137   :  { %711 = vmatprep.subr.bf16.mxu1 %v710_v36  ;;  %v232_v37 = vrot.slane %v219_v16, %v231_v35 }
 0x13a   :  { %713 = vmatpush3.bf16.msra.mxu1 %v712_v41 }
 0x13b   :  { %715 = vmatprep.subr.bf16.mxu1 %v714_v42 }
 0x13e   :  { %717 = vmatpush3.bf16.msra.mxu1 %v716_v47 }
 0x13f   :  { %719 = vmatprep.subr.bf16.mxu1 %v718_v48 }
 0x142   :  { %721 = vmatpush3.bf16.msra.mxu1 %v720_v53 }
 0x143   :  { %723 = vmatprep.subr.bf16.mxu1 %v722_v54 }
 0x146   :  { %725 = vmatpush3.bf16.msra.mxu1 %v724_v59 }
 0x147   :  { %727 = vmatprep.subr.bf16.mxu1 %v726_v60 }
 0x14a   :  { %729 = vmatpush3.bf16.msra.mxu1 %v728_v3 }
 0x14b   :  { %731 = vmatprep.subr.bf16.mxu1 %v730_v4 }
 0x14e   :  { %733 = vmatpush3.bf16.msra.mxu1 %v732_v7 }
 0x14f   :  { %735 = vmatprep.subr.bf16.mxu1 %v734_v9 }
 0x152   :  { %737 = vmatpush3.bf16.msra.mxu1 %v736_v12 }
 0x208   :  { %v302_v20 = vpop.f32.mrb[0].mxu1  ;;  %v373_v21 = vpop.f32.mrb[2].mxu0 }
 0x209   :  { %v303_v22 = vadd.f32 %v302_v20, %v224_v18  ;;  %v304_v23 = vpop.f32.mrb[1].mxu1  ;;  %v637_v24 = vpop.f32.mrb[3].mxu0  ;;  %v374_v41 = vadd.f32 %v373_v21, %v232_v37 }
 0x20a   :  { %v305_v25 = vadd.f32 %v304_v23, %v228_v19 }
 0x20b   :  { %v377_v0 = vmax.f32 %v303_v22, 0.0 }
 0x20c   :  { %v378_v26 = vmax.f32 %v305_v25, 0.0 }
 0x20e   :  { %482 = vmatprep.mubr.f32.mxu1 %v378_v26 }
 0x20f   :  { %483 = vmatmul.mubr.f32.vlgmr.msra.gmra.mrb[2].mxu1 %v377_v0 }
 0x2e2   :  { %v581_v28 = vpop.f32.mrb[2].mxu1 }
 0x2e3   :  { %v582_v30 = vpop.f32.mrb[3].mxu1 }
 0x2e4   :  { %v583_v31 = vadd.f32 %v582_v30, %v581_v28 }
 0x2e6   :  { %v485_v32 = vadd.f32 %v583_v31, %v522_v29 }
 0x2e8   :  { %v492_v33 = vsel %vm491_vm2, %v485_v32, 0.0 }
 0x2e9   :  { %493 = vadd.xlane.f32.xlu0 %v492_v33 }
 0x2ed   :  { %495 = vadd.xlane.f32.xlu0 %v485_v32 }
 0x376   :  { %v494_v34 = vpop.xlane.xlu0 %493 }
 0x377   :  { %v499_v39 = vadd.f32 %v494_v34, %v485_v32 }
 0x37a   :  { %v496_v36 = vpop.xlane.xlu0 %495 }
 0x37b   :  { %v497_v38 = vsub.f32 %v496_v36, %v494_v34 }
 0x37d   :  { %v498_v40 = vmul.f32 0.0625, %v497_v38 }
 0x37f   :  { %v500_v42 = vsub.f32 %v499_v39, %v498_v40 }
 0x381   :  { %v501_v43 = vsel %vm490_vm3, %v500_v42, %v374_v41 }
 0x382   :  { %502 = vst [vmem:[#allocation10] sm:$0xff] %v501_v43 }
 0x383   :  { %849 = shalt.err (!%p846_p8)
}
 0x384   :  { %s850_s10 = scalar_lea.hbm %s1019_s7, 128 }
 0x385   :  { %p851_p9 = scmp.ne.s32.totalorder %s1019_s7, %s850_s10  ;;  %p854_p10 = scmp.lt.u32.totalorder %s850_s10, %s1019_s7 }
 0x387   :  { %p856_p11 = pnand %p854_p10, %p851_p9 }
 0x389   :  { %859 = shalt.err (!%p856_p11)
}
 0x38a   :  { %512 = dma.vmem_to_hbm [thread:$0]  %s510_s30, 128, %s1019_s7, [#allocation4]  }
 0x38b   :  { %866 = dma.done.wait [#allocation4], 128  }
 0x38c   :  { %867 = vsyncadd [#allocation4], 4294967168 }
 0x38d   :  { %516 = vsyncpa [#allocation3], 1 }
 0x38e   :  { %517 = vsyncpa [#allocation6], 1 }
 0x38f   :  { %518 = vsyncpa [#allocation9], 1 }
 0x390   :  { %519 = vsyncpa [#allocation4], 1 }

</bundles_post_ra>
